<compile_context>
chip_gen: v7x
topology: tpu7x:2x2x1
jax: 0.10.0
libtpu: 0.0.40
codegen_flags: <defaults>
</compile_context>

<pallas_src>
from functools import partial

import jax
import jax.numpy as jnp
from jax.experimental import pallas as pl
from jax.experimental.pallas import tpu as pltpu


def _cdiv(a, b):
    return -(-a // b)


def _round_up(x, m):
    return _cdiv(x, m) * m


def _patch_embed_kernel(p_ref, w_ref, b_ref, o_ref):
    # p_ref: (TM, Kp) bf16 patches tile (streamed over M)
    # w_ref: (Kp, Ep) bf16 projection weight (VMEM-resident across the grid)
    # b_ref: (1,  Ep) f32 bias               (VMEM-resident across the grid)
    # o_ref: (TM, Ep) output tile
    acc = jnp.dot(p_ref[...], w_ref[...], preferred_element_type=jnp.float32)
    o_ref[...] = (acc + b_ref[...]).astype(o_ref.dtype)


def _pick_tm(M, K_pad, E_pad, out_bytes, tm_max=1024, vmem_budget=24 << 20):
    """Largest M-tile that fits a conservative VMEM budget, even block count."""
    TM = min(tm_max, _round_up(M, 8))

    def streamed_bytes(tm):
        # worst case: 3 input buffers + 2 output buffers for the streamed tiles
        return 3 * tm * K_pad * 2 + 2 * tm * E_pad * out_bytes

    while TM > 8 and streamed_bytes(TM) > vmem_budget:
        TM = max(8, _round_up(TM // 2, 8))
    if TM >= M:                 # single block: block_shape == full dim is legal
        TM = M
    # v7x megacore: prefer an even number (>= 2) of M-blocks so both
    # TensorCores get work under dimension_semantics=("parallel",).
    nblk = _cdiv(M, TM)
    if M >= 16 and nblk % 2 == 1:
        TM = max(8, _round_up(_cdiv(M, nblk + 1), 8))
    return TM


@partial(jax.jit, static_argnames=("patch_size", "out_dtype"))
def patch_embed(x, weight, bias, patch_size, out_dtype=None):
    """x: (B, C, H, W). weight: (E, C, ph, pw) [OIHW]. bias: (E,).

    Returns (B, num_patches, E) == Conv2d(stride=kernel=patch) -> flatten(2)
    -> transpose(1, 2) -> Identity().
    """
    B, C, H, W = x.shape
    ph, pw = patch_size
    assert H % ph == 0 and W % pw == 0
    gh, gw = H // ph, W // pw
    num_patches = gh * gw
    E = weight.shape[0]
    K = C * ph * pw
    M = B * num_patches

    out_dtype = jnp.dtype(x.dtype if out_dtype is None else out_dtype)
    out_bytes = out_dtype.itemsize

    # Lane-dense K/E; M is NOT padded (partial last block masked by Pallas).
    K_pad = _round_up(K, 128)
    E_pad = _round_up(E, 128)
    TM = _pick_tm(M, K_pad, E_pad, out_bytes)
    num_blocks = _cdiv(M, TM)

    # ---- patch extraction (glue; fused into the pallas_call's first operand
    # via allow_input_fusion). bf16 cast FIRST so any materialized bytes are 2B.
    xb = x.astype(jnp.bfloat16)
    patches = xb.reshape(B, C, gh, ph, gw, pw)
    patches = patches.transpose(0, 2, 4, 1, 3, 5)        # (B, gh, gw, C, ph, pw)
    patches = patches.reshape(M, K)                      # flatten order matches OIHW
    if K_pad != K:
        patches = jnp.pad(patches, ((0, 0), (0, K_pad - K)))

    w_mat = weight.reshape(E, K).T.astype(jnp.bfloat16)  # (K, E)
    if K_pad != K or E_pad != E:
        w_mat = jnp.pad(w_mat, ((0, K_pad - K), (0, E_pad - E)))

    b_mat = bias.reshape(1, E).astype(jnp.float32)
    if E_pad != E:
        b_mat = jnp.pad(b_mat, ((0, 0), (0, E_pad - E)))

    # VMEM limit from the real footprint (+50% / +2 MiB headroom), never the
    # whole chip (v7x has only 64 MiB per TensorCore).
    in_buffers = 3 if num_blocks >= 3 else 2
    footprint = (in_buffers * TM * K_pad * 2             # streamed bf16 patches
                 + K_pad * E_pad * 2                     # resident weight
                 + 2 * E_pad * 4                         # bias
                 + 2 * TM * E_pad * out_bytes)           # double-buffered output
    vmem_limit = int(min(max(footprint * 3 // 2 + (2 << 20), 16 << 20), 40 << 20))

    cost = pl.CostEstimate(
        flops=2 * M * K_pad * E_pad,
        transcendentals=0,
        bytes_accessed=(M * K_pad * 2                    # bf16 patches read
                        + K_pad * E_pad * 2              # bf16 weight read
                        + E_pad * 4                      # bias read
                        + M * E_pad * out_bytes),        # output write
    )

    # Deepen input buffering only when there are enough grid steps to benefit.
    if num_blocks >= 3:
        patches_spec = pl.BlockSpec((TM, K_pad), lambda i: (i, 0),
                                    pipeline_mode=pl.Buffered(3))
    else:
        patches_spec = pl.BlockSpec((TM, K_pad), lambda i: (i, 0))

    out = pl.pallas_call(
        _patch_embed_kernel,
        out_shape=jax.ShapeDtypeStruct((M, E_pad), out_dtype),
        grid=(num_blocks,),
        in_specs=[
            patches_spec,                                     # streamed over M
            pl.BlockSpec((K_pad, E_pad), lambda i: (0, 0)),   # resident weight
            pl.BlockSpec((1, E_pad), lambda i: (0, 0)),       # resident bias
        ],
        out_specs=pl.BlockSpec((TM, E_pad), lambda i: (i, 0)),
        compiler_params=pltpu.CompilerParams(
            dimension_semantics=("parallel",),
            allow_input_fusion=(True, False, False),
            vmem_limit_bytes=vmem_limit,
        ),
        cost_estimate=cost,
    )(patches, w_mat, b_mat)

    if E_pad != E:
        out = out[:, :E]     # no-op for typical ViT E (already a multiple of 128)
    return out.reshape(B, num_patches, E)


if __name__ == "__main__":
    # Small shapes consistent with the module: image 16x16, patch 4, in_c=4, embed_dim=32.
    B, C, H, W = 2, 4, 16, 16
    PATCH = (4, 4)
    EMBED = 32

    key = jax.random.PRNGKey(0)
    kx, kw, kb = jax.random.split(key, 3)

    x = jax.random.normal(kx, (B, C, H, W), dtype=jnp.float32)
    weight = 0.02 * jax.random.normal(kw, (EMBED, C, PATCH[0], PATCH[1]), dtype=jnp.float32)
    bias = 0.01 * jax.random.normal(kb, (EMBED,), dtype=jnp.float32)

    # Default path: output dtype matches x (module semantics).
    out = jax.block_until_ready(patch_embed(x, weight, bias, PATCH))

    # Reference: lax conv (same semantics as nn.Conv2d with stride=patch).
    ref = jax.lax.conv_general_dilated(
        x, weight, window_strides=PATCH, padding="VALID",
        dimension_numbers=("NCHW", "OIHW", "NCHW"),
    ) + bias[None, :, None, None]
    ref = ref.reshape(B, EMBED, -1).transpose(0, 2, 1)

    assert out.shape == (B, (H // PATCH[0]) * (W // PATCH[1]), EMBED)
    assert out.dtype == x.dtype
    # bf16 MXU inputs with f32 accumulation -> loosened tolerance vs. exact f32 ref.
    assert jnp.allclose(out, ref, atol=2e-2, rtol=2e-2)

    # bf16-output fast path (halves output HBM traffic / vst pressure on v5e/v6e
    # when the downstream transformer consumes bf16 anyway).
    out_bf16 = jax.block_until_ready(
        patch_embed(x, weight, bias, PATCH, out_dtype=jnp.bfloat16))
    assert out_bf16.dtype == jnp.bfloat16
    assert jnp.allclose(out_bf16.astype(jnp.float32), ref, atol=3e-2, rtol=3e-2)

    print("KERNEL_OK")
</pallas_src>

<mosaic_0001>
module attributes {stable_mosaic.version = 11 : i64} {
  func.func @_patch_embed_kernel(%arg0: i32, %arg1: memref<16x128xbf16, #tpu.memory_space<vmem>>, %arg2: memref<128x128xbf16, #tpu.memory_space<vmem>>, %arg3: memref<1x128xf32, #tpu.memory_space<vmem>>, %arg4: memref<16x128xf32, #tpu.memory_space<vmem>>) attributes {dimension_semantics = [#tpu.dimension_semantics<parallel>], iteration_bounds = array<i64: 2>, scalar_prefetch = 0 : i64, scratch_operands = 0 : i64, tpu.core_type = #tpu.core_type<tc>, window_params = [{transform_indices = @transform_0, window_bounds = array<i64: 16, 128>}, {pipeline_mode = #tpu.pipeline_mode<synchronous>, transform_indices = @transform_1, window_bounds = array<i64: 128, 128>}, {pipeline_mode = #tpu.pipeline_mode<synchronous>, transform_indices = @transform_2, window_bounds = array<i64: 1, 128>}, {transform_indices = @transform_3, window_bounds = array<i64: 16, 128>}]} {
    %c0 = arith.constant 0 : index
    %c0_0 = arith.constant 0 : index
    %0 = vector.load %arg1[%c0, %c0_0] : memref<16x128xbf16, #tpu.memory_space<vmem>>, vector<16x128xbf16>
    %c0_1 = arith.constant 0 : index
    %c0_2 = arith.constant 0 : index
    %1 = vector.load %arg2[%c0_1, %c0_2] : memref<128x128xbf16, #tpu.memory_space<vmem>>, vector<128x128xbf16>
    %cst = arith.constant dense<0.000000e+00> : vector<16x128xf32>
    %2 = tpu.matmul %0, %1, %cst {dimension_numbers = #tpu.dot_dimension_numbers<[1], [0], [0], [1], [0, 0, 1, 1], [], []>} : vector<16x128xbf16>, vector<128x128xbf16>, vector<16x128xf32> -> vector<16x128xf32>
    %c0_3 = arith.constant 0 : index
    %c0_4 = arith.constant 0 : index
    %3 = vector.load %arg3[%c0_3, %c0_4] : memref<1x128xf32, #tpu.memory_space<vmem>>, vector<1x128xf32>
    %4 = vector.broadcast %3 : vector<1x128xf32> to vector<16x128xf32>
    %5 = arith.addf %2, %4 : vector<16x128xf32>
    %c0_5 = arith.constant 0 : index
    %c0_6 = arith.constant 0 : index
    %6 = vector.load %arg4[%c0_5, %c0_6] : memref<16x128xf32, #tpu.memory_space<vmem>>, vector<16x128xf32>
    tpu.vector_store %arg4[%c0_5, %c0_6], %5 {strides = array<i32>} : memref<16x128xf32, #tpu.memory_space<vmem>>, vector<16x128xf32>,
    return
  }
  func.func @transform_0(%arg0: i32) -> (i32, i32) {
    %c0_i32 = arith.constant 0 : i32
    %c0_i32_0 = arith.constant 0 : i32
    return %arg0, %c0_i32 : i32, i32
  }
  func.func @transform_1(%arg0: i32) -> (i32, i32) {
    %c0_i32 = arith.constant 0 : i32
    %c0_i32_0 = arith.constant 0 : i32
    %c0_i32_1 = arith.constant 0 : i32
    return %c0_i32, %c0_i32_0 : i32, i32
  }
  func.func @transform_2(%arg0: i32) -> (i32, i32) {
    %c0_i32 = arith.constant 0 : i32
    %c0_i32_0 = arith.constant 0 : i32
    %c0_i32_1 = arith.constant 0 : i32
    return %c0_i32, %c0_i32_0 : i32, i32
  }
  func.func @transform_3(%arg0: i32) -> (i32, i32) {
    %c0_i32 = arith.constant 0 : i32
    %c0_i32_0 = arith.constant 0 : i32
    return %arg0, %c0_i32 : i32, i32
  }
}

</mosaic_0001>

<bundles_post_ra>
// kernel: patch_embed.2
= control target key start
LH: loop header
LB: loop body
LE: loop exit
PB: predicated region body
PF: predicated region fallthrough
CT: control target
= control target key end

     0   :  { %s754_s0 = inlined_call_operand.vmem [shape: bf16[128,128], index: 0, kind: input, shape index: {}]   ;;  %s755_s1 = inlined_call_operand.vmem [shape: f32[1,128], index: 1, kind: input, shape index: {}]   ;;  %s756_s2 = inlined_call_operand.vmem [shape: bf16[32,64], index: 2, kind: input, shape index: {}]   ;;  %s757_s3 = inlined_call_operand.<no memory space> [shape: bf16[], index: 3, kind: input, shape index: {}]   ;;  %s758_s4 = inlined_call_operand.hbm [shape: f32[32,128], index: 4, kind: output, shape index: {}]  }
   0x1   :  { %v9_v0 = vstv %s757_s3 }
   0x2   :  { %v621_v1 = vunpack.i.l.bf16 %v9_v0 }
   0x3   :  { %14 = vsyncpa [#allocation8], 0 }
   0x4   :  { %16 = vsyncpa [#allocation8 + $0x1], 0  ;;  %s623_s17 = smov 0   ;;  %s625_s18 = smov 0  }
   0x5   :  { %s627_s19 = smov 0   ;;  %s629_s20 = smov 0  }
   0x6 LB: > { %s644_s3 = sadd.s32 4294967295, %s586_s20   ;;  %s419_s21 = sadd.s32 4294967294, %s586_s20   ;;  %s586_s20 = sphi %s629_s20, %s764_s20   ;;  %s582_s19 = sphi %s627_s19, %s763_s19   ;;  %s578_s18 = sphi %s625_s18, %s762_s18   ;;  %s574_s17 = sphi %s623_s17, %s761_s17  }
   0x7   : > { %s648_s22 = sadd.s32 1, %s586_s20   ;;  %s97_s23 = sadd.s32 1, %s582_s19 }
   0x8   : > { %s94_s24 = ssub.s32 %s586_s20, %s648_s22  ;;  %p107_p0 = scmp.ne.s32.totalorder %s582_s19, %s578_s18 }
   0x9   : > { %p95_p1 = scmp.eq.s32.totalorder %s94_s24, 0  ;;  %p108_p2 = scmp.eq.s32.totalorder %s644_s3, 1 }
   0xa   : > { %p113_p3 = scmp.ne.s32.totalorder %s578_s18, %s574_s17  ;;  %p114_p4 = scmp.eq.s32.totalorder %s419_s21, 1 }
   0xb   : > { %s659_s25 = scalar_select %p95_p1, %s582_s19, %s97_s23  }
   0xc   : > { %p661_p5 = por %p108_p2, %p107_p0  ;;  %p665_p6 = por %p114_p4, %p113_p3 }
   0xd   : > { %p422_p7 = scmp.ge.s32.totalorder %s586_s20, 1  ;;  %p147_p8 = scmp.lt.s32.totalorder %s586_s20, 3 }
   0xf   : > { %p148_p9 = pnand %p422_p7, %p147_p8 }
  0x11   : > { %151 = sbr.rel (%p148_p9) target bundleno = 288 (0x120), region = 32 }
  0x18   : > { %v515_v2 = vld [vmem:[%s754_s0] sm:$0xff]   ;;  %v588_v3 = vmov 0.0   ;;  %v190_v4 = vlaneseq  ;;  %v516_v5 = vld [vmem:[%s754_s0 + $0x8] sm:$0xff]   ;;  %vm589_vm0 = vmmov 0   ;;  %s424_s6 = sshll.u32 %s644_s3, 1  ;;  %v517_v7 = vld [vmem:[%s754_s0 + $0x10] sm:$0xff]  }
  0x19   : > { %452 = vmatprep.subr.bf16.mxu0 %v588_v3  ;;  %468 = vmatprep.mubr.msk.bf16.mxu0 %vm589_vm0, %v588_v3  ;;  %p172_p10 = scmp.lt.s32.totalorder %s424_s6, 3  ;;  %v518_v9 = vld [vmem:[%s754_s0 + $0x18] sm:$0xff]   ;;  %v519_v16 = vld [vmem:[%s754_s0 + $0x20] sm:$0xff]   ;;  %v520_v17 = vld [vmem:[%s754_s0 + $0x28] sm:$0xff]   ;;  %s168_s5 = sand.u32 1, %s578_s18  }
  0x1a   : > { %453 = vmatpush3.bf16.msra.mxu0 %v515_v2  ;;  %v191_v6 = vand.u32 127, %v190_v4  ;;  %v521_v18 = vld [vmem:[%s754_s0 + $0x30] sm:$0xff]   ;;  %v522_v19 = vld [vmem:[%s754_s0 + $0x38] sm:$0xff]   ;;  %v427_v21 = vld [vmem:[%s755_s1] ss:$0 sm:$0xff]  ;;  %s442_s11 = sshll.u32 %s644_s3, 8 }
  0x1b   : > { %454 = vmatprep.subr.bf16.mxu0 %v588_v3  ;;  %s766_s6 = smov (!%p172_p10, %s424_s6), 3  ;;  %s711_s14 = scalar_lea.hbm %s758_s4, %s442_s11 }
  0x1c   : > { %s425_s9 = sshll.u32 %s766_s6, 2  ;;  %vm193_vm1 = vcmp.lt.s32.totalorder %v191_v6, 64  ;;  %s423_s6 = sshll.u32 %s168_s5, 4 }
  0x1d   : > { %s175_s12 = scalar_lea.vmem %s756_s2, %s425_s9  ;;  %s170_s9 = scalar_lea.vmem [#allocation7], %s423_s6 }
  0x1e   : > { %455 = vmatpush3.bf16.msra.mxu0 %v516_v5  ;;  %v187_v8 = vld [vmem:[%s175_s12] sm:$0xff]   ;;  %s357_s10 = sshll.u32 %s170_s9, 4  ;;  %s713_s15 = scalar_lea.sflag [#allocation8], %s168_s5  ;;  %s706_s10 = int_to_ptr.vmem [resolvable:$true] %s357_s10 }
  0x1f   : > { %456 = vmatprep.subr.bf16.mxu0 %v588_v3  ;;  %v188_v10 = vunpack.c.l.bf16 %v187_v8  ;;  %v209_v11 = vunpack.c.h.bf16 %v187_v8  ;;  %s524_s3 = scalar_lea.vmem %s706_s10, 256  ;;  %s590_s16 = smov [#allocation7]  }
  0x20   : > { %p525_p11 = scmp.ne.s32.totalorder %s706_s10, %s524_s3  ;;  %s528_s21 = sshll.u32 %s590_s16, 4  ;;  %s529_s21 = int_to_ptr.vmem [resolvable:$false] %s528_s21 }
  0x21   : > { %v194_v12 = vsel %vm193_vm1, %v188_v10, %v621_v1  ;;  %v215_v13 = vsel %vm193_vm1, %v209_v11, %v621_v1  ;;  %s530_s23 = scalar_lea.vmem %s529_s21, 512  ;;  %p531_p0 = scmp.lt.s32.totalorder %s706_s10, %s529_s21 }
  0x22   : > { %457 = vmatpush3.bf16.msra.mxu0 %v517_v7  ;;  %v195_v14 = vpack.c.bf16 %v588_v3, %v194_v12  ;;  %v217_v15 = vpack.c.bf16 %v588_v3, %v215_v13  ;;  %p526_p12 = pnand %p525_p11, %p661_p5  ;;  %p532_p1 = scmp.lt.s32.totalorder %s530_s23, %s524_s3 }
  0x23   : > { %458 = vmatprep.subr.bf16.mxu0 %v588_v3 }
  0x24   : > { %197 = vst [vmem:[#allocation9] sm:$0xf] %v195_v14  ;;  %219 = vst [vmem:[#allocation9 + $0x4] sm:$0xf] %v217_v15  ;;  %p527_p13 = pneg %p526_p12  ;;  %p533_p2 = por %p532_p1, %p531_p0 }
  0x26   : > { %459 = vmatpush3.bf16.msra.mxu0 %v518_v9  ;;  %p534_p3 = pnand %p533_p2, %p527_p13 }
  0x27   : > { %460 = vmatprep.subr.bf16.mxu0 %v588_v3 }
  0x2a   : > { %461 = vmatpush3.bf16.msra.mxu0 %v519_v16 }
  0x2b   : > { %462 = vmatprep.subr.bf16.mxu0 %v588_v3  ;;  %v523_v20 = vld [vmem:[#allocation9] sm:$0xff]  }
  0x2e   : > { %463 = vmatpush3.bf16.msra.mxu0 %v520_v17 }
  0x2f   : > { %464 = vmatprep.subr.bf16.mxu0 %v588_v3 }
  0x32   : > { %465 = vmatpush3.bf16.msra.mxu0 %v521_v18 }
  0x33   : > { %466 = vmatprep.subr.bf16.mxu0 %v588_v3 }
  0x36   : > { %467 = vmatpush3.bf16.msra.mxu0 %v522_v19 }
  0x39   : > { %469 = vmatmul.mubr.bf16.vlgmr.msra.gmra.mrb[0].mxu0 %v523_v20 }
 0x10c   : > { %v334_v22 = vpop.f32.mrb[0].mxu0 }
 0x10d   : > { %v335_v23 = vadd.f32 %v427_v21, %v334_v22  ;;  %v470_v24 = vpop.f32.mrb[1].mxu0 }
 0x10e   : > { %v337_v25 = vpop.f32.mrb[2].mxu0 }
 0x10f   : > { %341 = vst [vmem:[%s170_s9] sm:$0xff] %v335_v23  ;;  %v338_v26 = vadd.f32 %v427_v21, %v337_v25  ;;  %v471_v27 = vpop.f32.mrb[3].mxu0 }
 0x111   : > { %342 = vst [vmem:[%s170_s9 + $0x8] sm:$0xff] %v338_v26 }
 0x112   : > { %537 = shalt.err (!%p534_p3)
}
 0x113   : > { %s538_s24 = scalar_lea.hbm %s711_s14, 256  ;;  %s542_s30 = scalar_lea.hbm %s758_s4, 512 }
 0x114   : > { %p539_p4 = scmp.ne.s32.totalorder %s711_s14, %s538_s24  ;;  %p543_p9 = scmp.lt.u32.totalorder %s711_s14, %s758_s4 }
 0x115   : > { %p544_p10 = scmp.lt.u32.totalorder %s542_s30, %s538_s24  ;;  %p546_p12 = scmp.lt.u32.totalorder %s538_s24, %s711_s14 }
 0x116   : > { %p540_p7 = pnand %p539_p4, %p661_p5 }
 0x117   : > { %p545_p11 = por %p544_p10, %p543_p9 }
 0x118   : > { %p541_p8 = pneg %p540_p7 }
 0x119   : > { %p547_p13 = por %p546_p12, %p545_p11 }
 0x11b   : > { %p548_p0 = pnand %p547_p13, %p541_p8 }
 0x11d   : > { %551 = shalt.err (!%p548_p0)
}
 0x11e   : > { %s591_s7 = smov 128   ;;  %s592_s8 = smov 8  }
 0x11f   : > { %472 = dma.vmem_to_hbm [thread:$0]  (%p661_p5), %s706_s10, 256, %s711_s14, %s713_s15, %s591_s7, %s591_s7, %s592_s8  }
 0x120 PF: > { %p478_p1 = scmp.ge.s32.totalorder %s586_s20, 2  ;;  %s372_s9 = sand.u32 1, %s574_s17  }
 0x121   : > { %s373_s11 = scalar_lea.sflag [#allocation8], %s372_s9 }
 0x122   : > { %p475_p2 = pnand %p478_p1, %p665_p6 }
 0x124   : > { %569 = dma.done.wait (!%p475_p2), %s373_s11, 256  }
 0x125   : > { %571 = vsyncadd (!%p475_p2), %s373_s11, 4294967040  ;;  %p19_p3 = scmp.ge.s32.totalorder %s648_s22, 4   ;;  %s761_s17 = smov %s578_s18 }
 0x126   : > { %s762_s18 = smov %s582_s19  ;;  %s763_s19 = smov %s659_s25 }
 0x127   : > { %s764_s20 = smov %s648_s22  ;;  %21 = sbr.rel (!%p19_p3) target bundleno = 6 (0x6), region = 69 }
 0x12e   :  { %378 = vsyncpa [#allocation8], 1 }
 0x12f   :  { %380 = vsyncpa [#allocation8 + $0x1], 1 }

</bundles_post_ra>
